<compile_context>
chip_gen: v6e
topology: v6e:2x2x1
jax: 0.10.0
libtpu: 0.0.40
codegen_flags: <defaults>
</compile_context>

<pallas_src>
import jax
import jax.numpy as jnp
from jax.experimental import pallas as pl
from jax.experimental.pallas import tpu as pltpu


def _round_up(x, m):
    return (x + m - 1) // m * m


def _critic_kernel(x_ref, w1_ref, b1_ref, w2_ref, b2_ref, w3_ref, b3_ref,
                   o_ref):
    # Layer 1: single MXU push (concat already folded into x / W1), f32 acc.
    h1 = jnp.dot(x_ref[...], w1_ref[...], preferred_element_type=jnp.float32)
    h1 = jnp.maximum(h1 + b1_ref[...], 0.0)          # bias + ReLU in f32 (VPU)

    # Layer 2.
    h2 = jnp.dot(h1.astype(jnp.bfloat16), w2_ref[...],
                 preferred_element_type=jnp.float32)
    h2 = jnp.maximum(h2 + b2_ref[...], 0.0)

    # Layer 3 (out_features == 1): h2 @ W3_col -> [tile_b, 1].  Keeping W3 as
    # an [H, 1] column means neither operand needs a transpose (the old
    # dot_general row-form risked transposing the whole h2 tile).  The tiny
    # [tile_b, 1] store is negligible traffic.
    q = jnp.dot(h2.astype(jnp.bfloat16), w3_ref[...],
                preferred_element_type=jnp.float32)
    o_ref[...] = (q + b3_ref[0, 0]).astype(o_ref.dtype)


def critic_net_forward(state, action, params, *, tile_b=512):
    """state: [B, n_obs], action: [B, n_action] -> q: [B, 1] (float32)."""
    w1, b1, w2, b2, w3, b3 = params
    d_in, hidden = w1.shape
    assert hidden % 128 == 0, (
        "hidden must be padded to a multiple of 128 (use init_critic_params)")
    assert state.shape[1] + action.shape[1] == d_in
    B = state.shape[0]

    # Fused concat + one-time bf16 cast in the wrapper (one XLA fusion);
    # the kernel never re-casts activations coming from HBM.
    x = jnp.concatenate([state, action], axis=1).astype(jnp.bfloat16)

    # ---- batch tiling -------------------------------------------------------
    b_pad = _round_up(max(B, 8), 8)
    if b_pad <= 256:
        # Too small to split into two lane-aligned (>=128) tiles; single tile
        # equal to the (8-padded) batch — layout-legal as the full array dim.
        tile = b_pad
    else:
        b_pad = _round_up(b_pad, 128)
        # Largest 128-multiple tile <= requested cap that still leaves >= 2
        # tiles, so the "parallel" batch axis is sharded across both
        # TensorCores on v7x.  Padding waste is bounded by tile-1 rows.
        tile = max(128, min(_round_up(tile_b, 128), (b_pad // 2) // 128 * 128))
        b_pad = _round_up(b_pad, tile)
    if b_pad != B:
        x = jnp.pad(x, ((0, b_pad - B), (0, 0)))
    grid = (b_pad // tile,)

    # ---- VMEM budget (with headroom) ---------------------------------------
    def _buf(rows, cols, itemsize):          # (8,128)-padded VMEM tile bytes
        return _round_up(rows, 8) * _round_up(cols, 128) * itemsize

    weight_bytes = (_buf(d_in, hidden, 2) + _buf(hidden, hidden, 2)
                    + _buf(hidden, 1, 2) + 2 * _buf(1, hidden, 4))
    vmem_needed = (2 * weight_bytes                 # conservative: 2 buffers
                   + 2 * _buf(tile, d_in, 2)        # double-buffered x tile
                   + 2 * _buf(tile, 1, 4))          # double-buffered out tile
    vmem_limit = int(min(max(2 * vmem_needed + (4 << 20), 16 << 20), 60 << 20))

    cparams = pltpu.CompilerParams(
        # Batch tiles are independent: shard across TCs on v7x; no-op on
        # v5e/v6e single-core chips.
        dimension_semantics=("parallel",),
        vmem_limit_bytes=vmem_limit,
    )

    def run(single_buffer_weights):
        const = lambda i: (0, 0)
        if single_buffer_weights:
            # Weights never change block index -> one buffer is enough;
            # halves weight VMEM (matters for large hidden / v7x / v5e).
            w_spec = lambda shape: pl.BlockSpec(shape, const,
                                                pipeline_mode=pl.Buffered(1))
        else:
            w_spec = lambda shape: pl.BlockSpec(shape, const)
        return pl.pallas_call(
            _critic_kernel,
            out_shape=jax.ShapeDtypeStruct((b_pad, 1), jnp.float32),
            grid=grid,
            in_specs=[
                pl.BlockSpec((tile, d_in), lambda i: (i, 0)),   # x tile
                w_spec((d_in, hidden)),                         # W1
                w_spec((1, hidden)),                            # b1
                w_spec((hidden, hidden)),                       # W2
                w_spec((1, hidden)),                            # b2
                w_spec((hidden, 1)),                            # W3 (column)
                pl.BlockSpec((1, 1), const,
                             memory_space=pltpu.MemorySpace.SMEM),  # b3 scalar
            ],
            out_specs=pl.BlockSpec((tile, 1), lambda i: (i, 0)),
            compiler_params=cparams,
        )(x, w1, b1, w2, b2, w3, b3)

    try:
        q = run(single_buffer_weights=True)
    except Exception:
        # pl.Buffered(1) (single-buffered weights) unsupported on this
        # jax/Mosaic build -> fall back to default double-buffering.
        q = run(single_buffer_weights=False)

    return q[:B]


def init_critic_params(key, n_obs, n_action, hidden_size):
    """PyTorch nn.Linear default init + lin3's uniform(-3e-3, 3e-3) override.

    `hidden` is zero-padded to a multiple of 128 (lane-dense matmul dims; use
    256-multiples for best MXU fill on v6e/v7x).  Zero padding keeps the
    forward math exactly equal to the unpadded module.  Weights are stored
    bf16 (MXU-native); biases stay f32.  W3 is stored as an [H, 1] column.
    """
    d_in = n_obs + n_action
    hidden_p = _round_up(hidden_size, 128)
    keys = jax.random.split(key, 6)

    def uniform(k, shape, bound):
        return jax.random.uniform(k, shape, jnp.float32, -bound, bound)

    bound1 = float(d_in) ** -0.5
    w1 = uniform(keys[0], (d_in, hidden_size), bound1)
    b1 = uniform(keys[1], (1, hidden_size), bound1)
    bound2 = float(hidden_size) ** -0.5
    w2 = uniform(keys[2], (hidden_size, hidden_size), bound2)
    b2 = uniform(keys[3], (1, hidden_size), bound2)
    w3 = uniform(keys[4], (hidden_size, 1), 0.003)
    b3 = uniform(keys[5], (1, 1), 0.003)

    ph = hidden_p - hidden_size
    w1 = jnp.pad(w1, ((0, 0), (0, ph)))
    b1 = jnp.pad(b1, ((0, 0), (0, ph)))
    w2 = jnp.pad(w2, ((0, ph), (0, ph)))
    b2 = jnp.pad(b2, ((0, 0), (0, ph)))
    w3 = jnp.pad(w3, ((0, ph), (0, 0)))

    bf = jnp.bfloat16
    return (w1.astype(bf), b1, w2.astype(bf), b2, w3.astype(bf), b3)


def _reference_bf16(state, action, params):
    """Same bf16-input / f32-accumulate math as the kernel (tight check)."""
    w1, b1, w2, b2, w3, b3 = params
    bf, f32 = jnp.bfloat16, jnp.float32
    x = jnp.concatenate([state, action], axis=1).astype(bf)
    h = jnp.maximum(jnp.dot(x, w1, preferred_element_type=f32) + b1, 0.0)
    h = jnp.maximum(jnp.dot(h.astype(bf), w2, preferred_element_type=f32) + b2,
                    0.0)
    return jnp.dot(h.astype(bf), w3, preferred_element_type=f32) + b3


def _reference_f32(state, action, params):
    """Full-f32 math of the original PyTorch module (loose check)."""
    w1, b1, w2, b2, w3, b3 = params
    f32 = jnp.float32
    x = jnp.concatenate([state, action], axis=1).astype(f32)
    h = jnp.maximum(x @ w1.astype(f32) + b1, 0.0)
    h = jnp.maximum(h @ w2.astype(f32) + b2, 0.0)
    return h @ w3.astype(f32) + b3


if __name__ == "__main__":
    n_obs, n_action, hidden_size = 16, 8, 32
    batch = 8

    key = jax.random.PRNGKey(0)
    k_params, k_state, k_action = jax.random.split(key, 3)

    params = init_critic_params(k_params, n_obs, n_action, hidden_size)
    state = jax.random.normal(k_state, (batch, n_obs), jnp.float32)
    action = jax.random.normal(k_action, (batch, n_action), jnp.float32)

    q = jax.block_until_ready(critic_net_forward(state, action, params))
    assert q.shape == (batch, 1)

    # Tight check vs a reference using the kernel's bf16-in / f32-accum math.
    assert jnp.allclose(q, _reference_bf16(state, action, params),
                        atol=1e-4), "mismatch vs bf16 reference"
    # Loose check vs the original full-f32 module semantics.
    assert jnp.allclose(q, _reference_f32(state, action, params),
                        atol=5e-3), "mismatch vs f32 reference"

    # Multi-tile grid path (batch 300 -> padded 384, tile 128, grid=(3,)).
    batch2 = 300
    k_s2, k_a2 = jax.random.split(jax.random.PRNGKey(1), 2)
    state2 = jax.random.normal(k_s2, (batch2, n_obs), jnp.float32)
    action2 = jax.random.normal(k_a2, (batch2, n_action), jnp.float32)
    q2 = jax.block_until_ready(critic_net_forward(state2, action2, params))
    assert q2.shape == (batch2, 1)
    assert jnp.allclose(q2, _reference_bf16(state2, action2, params),
                        atol=1e-4), "mismatch vs bf16 reference (grid=3)"

    # Large-tile path (batch 1200 -> padded 1536, tile 512, grid=(3,)).
    batch3 = 1200
    k_s3, k_a3 = jax.random.split(jax.random.PRNGKey(2), 2)
    state3 = jax.random.normal(k_s3, (batch3, n_obs), jnp.float32)
    action3 = jax.random.normal(k_a3, (batch3, n_action), jnp.float32)
    q3 = jax.block_until_ready(critic_net_forward(state3, action3, params))
    assert q3.shape == (batch3, 1)
    assert jnp.allclose(q3, _reference_bf16(state3, action3, params),
                        atol=1e-4), "mismatch vs bf16 reference (tile=512)"

    print("KERNEL_OK")
</pallas_src>

<mosaic_0001>
module attributes {stable_mosaic.version = 11 : i64} {
  func.func @_critic_kernel(%arg0: i32, %arg1: memref<8x24xbf16, #tpu.memory_space<vmem>>, %arg2: memref<24x128xbf16, #tpu.memory_space<vmem>>, %arg3: memref<1x128xf32, #tpu.memory_space<vmem>>, %arg4: memref<128x128xbf16, #tpu.memory_space<vmem>>, %arg5: memref<1x128xf32, #tpu.memory_space<vmem>>, %arg6: memref<128x1xbf16, #tpu.memory_space<vmem>>, %arg7: memref<1x1xf32, #tpu.memory_space<smem>>, %arg8: memref<8x1xf32, #tpu.memory_space<vmem>>) attributes {dimension_semantics = [#tpu.dimension_semantics<parallel>], iteration_bounds = array<i64: 1>, scalar_prefetch = 0 : i64, scratch_operands = 0 : i64, tpu.core_type = #tpu.core_type<tc>, window_params = [{transform_indices = @transform_0, window_bounds = array<i64: 8, 24>}, {pipeline_mode = #tpu.pipeline_mode<synchronous>, transform_indices = @transform_1, window_bounds = array<i64: 24, 128>}, {pipeline_mode = #tpu.pipeline_mode<synchronous>, transform_indices = @transform_2, window_bounds = array<i64: 1, 128>}, {pipeline_mode = #tpu.pipeline_mode<synchronous>, transform_indices = @transform_3, window_bounds = array<i64: 128, 128>}, {pipeline_mode = #tpu.pipeline_mode<synchronous>, transform_indices = @transform_4, window_bounds = array<i64: 1, 128>}, {pipeline_mode = #tpu.pipeline_mode<synchronous>, transform_indices = @transform_5, window_bounds = array<i64: 128, 1>}, {transform_indices = @transform_6, window_bounds = array<i64: 1, 1>}, {transform_indices = @transform_7, window_bounds = array<i64: 8, 1>}]} {
    %c0 = arith.constant 0 : index
    %c0_0 = arith.constant 0 : index
    %0 = vector.load %arg1[%c0, %c0_0] : memref<8x24xbf16, #tpu.memory_space<vmem>>, vector<8x24xbf16>
    %c0_1 = arith.constant 0 : index
    %c0_2 = arith.constant 0 : index
    %1 = vector.load %arg2[%c0_1, %c0_2] : memref<24x128xbf16, #tpu.memory_space<vmem>>, vector<24x128xbf16>
    %cst = arith.constant dense<0.000000e+00> : vector<8x128xf32>
    %2 = tpu.matmul %0, %1, %cst {dimension_numbers = #tpu.dot_dimension_numbers<[1], [0], [0], [1], [0, 0, 1, 1], [], []>} : vector<8x24xbf16>, vector<24x128xbf16>, vector<8x128xf32> -> vector<8x128xf32>
    %c0_3 = arith.constant 0 : index
    %c0_4 = arith.constant 0 : index
    %3 = vector.load %arg3[%c0_3, %c0_4] : memref<1x128xf32, #tpu.memory_space<vmem>>, vector<1x128xf32>
    %4 = vector.broadcast %3 : vector<1x128xf32> to vector<8x128xf32>
    %5 = arith.addf %2, %4 : vector<8x128xf32>
    %cst_5 = arith.constant 0.000000e+00 : f32
    %6 = vector.broadcast %cst_5 : f32 to vector<8x128xf32>
    %7 = arith.maximumf %5, %6 : vector<8x128xf32>
    %8 = arith.truncf %7 : vector<8x128xf32> to vector<8x128xbf16>
    %c0_6 = arith.constant 0 : index
    %c0_7 = arith.constant 0 : index
    %9 = vector.load %arg4[%c0_6, %c0_7] : memref<128x128xbf16, #tpu.memory_space<vmem>>, vector<128x128xbf16>
    %cst_8 = arith.constant dense<0.000000e+00> : vector<8x128xf32>
    %10 = tpu.matmul %8, %9, %cst_8 {dimension_numbers = #tpu.dot_dimension_numbers<[1], [0], [0], [1], [0, 0, 1, 1], [], []>} : vector<8x128xbf16>, vector<128x128xbf16>, vector<8x128xf32> -> vector<8x128xf32>
    %c0_9 = arith.constant 0 : index
    %c0_10 = arith.constant 0 : index
    %11 = vector.load %arg5[%c0_9, %c0_10] : memref<1x128xf32, #tpu.memory_space<vmem>>, vector<1x128xf32>
    %12 = vector.broadcast %11 : vector<1x128xf32> to vector<8x128xf32>
    %13 = arith.addf %10, %12 : vector<8x128xf32>
    %cst_11 = arith.constant 0.000000e+00 : f32
    %14 = vector.broadcast %cst_11 : f32 to vector<8x128xf32>
    %15 = arith.maximumf %13, %14 : vector<8x128xf32>
    %16 = arith.truncf %15 : vector<8x128xf32> to vector<8x128xbf16>
    %c0_12 = arith.constant 0 : index
    %c0_13 = arith.constant 0 : index
    %17 = vector.load %arg6[%c0_12, %c0_13] : memref<128x1xbf16, #tpu.memory_space<vmem>>, vector<128x1xbf16>
    %cst_14 = arith.constant dense<0.000000e+00> : vector<8x1xf32>
    %18 = tpu.matmul %16, %17, %cst_14 {dimension_numbers = #tpu.dot_dimension_numbers<[1], [0], [0], [1], [0, 0, 1, 1], [], []>} : vector<8x128xbf16>, vector<128x1xbf16>, vector<8x1xf32> -> vector<8x1xf32>
    %c0_15 = arith.constant 0 : index
    %c0_16 = arith.constant 0 : index
    %19 = memref.load %arg7[%c0_15, %c0_16] : memref<1x1xf32, #tpu.memory_space<smem>>
    %20 = vector.broadcast %19 : f32 to vector<8x1xf32>
    %21 = arith.addf %18, %20 : vector<8x1xf32>
    %c0_17 = arith.constant 0 : index
    %c0_18 = arith.constant 0 : index
    %22 = vector.load %arg8[%c0_17, %c0_18] : memref<8x1xf32, #tpu.memory_space<vmem>>, vector<8x1xf32>
    tpu.vector_store %arg8[%c0_17, %c0_18], %21 {strides = array<i32>} : memref<8x1xf32, #tpu.memory_space<vmem>>, vector<8x1xf32>,
    return
  }
  func.func @transform_0(%arg0: i32) -> (i32, i32) {
    %c0_i32 = arith.constant 0 : i32
    %c0_i32_0 = arith.constant 0 : i32
    return %arg0, %c0_i32 : i32, i32
  }
  func.func @transform_1(%arg0: i32) -> (i32, i32) {
    %c0_i32 = arith.constant 0 : i32
    %c0_i32_0 = arith.constant 0 : i32
    %c0_i32_1 = arith.constant 0 : i32
    return %c0_i32, %c0_i32_0 : i32, i32
  }
  func.func @transform_2(%arg0: i32) -> (i32, i32) {
    %c0_i32 = arith.constant 0 : i32
    %c0_i32_0 = arith.constant 0 : i32
    %c0_i32_1 = arith.constant 0 : i32
    return %c0_i32, %c0_i32_0 : i32, i32
  }
  func.func @transform_3(%arg0: i32) -> (i32, i32) {
    %c0_i32 = arith.constant 0 : i32
    %c0_i32_0 = arith.constant 0 : i32
    %c0_i32_1 = arith.constant 0 : i32
    return %c0_i32, %c0_i32_0 : i32, i32
  }
  func.func @transform_4(%arg0: i32) -> (i32, i32) {
    %c0_i32 = arith.constant 0 : i32
    %c0_i32_0 = arith.constant 0 : i32
    %c0_i32_1 = arith.constant 0 : i32
    return %c0_i32, %c0_i32_0 : i32, i32
  }
  func.func @transform_5(%arg0: i32) -> (i32, i32) {
    %c0_i32 = arith.constant 0 : i32
    %c0_i32_0 = arith.constant 0 : i32
    %c0_i32_1 = arith.constant 0 : i32
    return %c0_i32, %c0_i32_0 : i32, i32
  }
  func.func @transform_6(%arg0: i32) -> (i32, i32) {
    %c0_i32 = arith.constant 0 : i32
    %c0_i32_0 = arith.constant 0 : i32
    %c0_i32_1 = arith.constant 0 : i32
    return %c0_i32, %c0_i32_0 : i32, i32
  }
  func.func @transform_7(%arg0: i32) -> (i32, i32) {
    %c0_i32 = arith.constant 0 : i32
    %c0_i32_0 = arith.constant 0 : i32
    return %arg0, %c0_i32 : i32, i32
  }
}

module attributes {stable_mosaic.version = 11 : i64} {
  func.func @_critic_kernel(%arg0: i32, %arg1: memref<8x24xbf16, #tpu.memory_space<vmem>>, %arg2: memref<24x128xbf16, #tpu.memory_space<vmem>>, %arg3: memref<1x128xf32, #tpu.memory_space<vmem>>, %arg4: memref<128x128xbf16, #tpu.memory_space<vmem>>, %arg5: memref<1x128xf32, #tpu.memory_space<vmem>>, %arg6: memref<128x1xbf16, #tpu.memory_space<vmem>>, %arg7: memref<1x1xf32, #tpu.memory_space<smem>>, %arg8: memref<8x1xf32, #tpu.memory_space<vmem>>) attributes {dimension_semantics = [#tpu.dimension_semantics<parallel>], iteration_bounds = array<i64: 1>, scalar_prefetch = 0 : i64, scratch_operands = 0 : i64, tpu.core_type = #tpu.core_type<tc>, window_params = [{transform_indices = @transform_0, window_bounds = array<i64: 8, 24>}, {pipeline_mode = #tpu.pipeline_mode<synchronous>, transform_indices = @transform_1, window_bounds = array<i64: 24, 128>}, {pipeline_mode = #tpu.pipeline_mode<synchronous>, transform_indices = @transform_2, window_bounds = array<i64: 1, 128>}, {pipeline_mode = #tpu.pipeline_mode<synchronous>, transform_indices = @transform_3, window_bounds = array<i64: 128, 128>}, {pipeline_mode = #tpu.pipeline_mode<synchronous>, transform_indices = @transform_4, window_bounds = array<i64: 1, 128>}, {pipeline_mode = #tpu.pipeline_mode<synchronous>, transform_indices = @transform_5, window_bounds = array<i64: 128, 1>}, {transform_indices = @transform_6, window_bounds = array<i64: 1, 1>}, {transform_indices = @transform_7, window_bounds = array<i64: 8, 1>}]} {
    %c0 = arith.constant 0 : index
    %c0_0 = arith.constant 0 : index
    %0 = vector.load %arg1[%c0, %c0_0] : memref<8x24xbf16, #tpu.memory_space<vmem>>, vector<8x24xbf16>
    %c0_1 = arith.constant 0 : index
    %c0_2 = arith.constant 0 : index
    %1 = vector.load %arg2[%c0_1, %c0_2] : memref<24x128xbf16, #tpu.memory_space<vmem>>, vector<24x128xbf16>
    %cst = arith.constant dense<0.000000e+00> : vector<8x128xf32>
    %2 = tpu.matmul %0, %1, %cst {dimension_numbers = #tpu.dot_dimension_numbers<[1], [0], [0], [1], [0, 0, 1, 1], [], []>} : vector<8x24xbf16>, vector<24x128xbf16>, vector<8x128xf32> -> vector<8x128xf32>
    %c0_3 = arith.constant 0 : index
    %c0_4 = arith.constant 0 : index
    %3 = vector.load %arg3[%c0_3, %c0_4] : memref<1x128xf32, #tpu.memory_space<vmem>>, vector<1x128xf32>
    %4 = vector.broadcast %3 : vector<1x128xf32> to vector<8x128xf32>
    %5 = arith.addf %2, %4 : vector<8x128xf32>
    %cst_5 = arith.constant 0.000000e+00 : f32
    %6 = vector.broadcast %cst_5 : f32 to vector<8x128xf32>
    %7 = arith.maximumf %5, %6 : vector<8x128xf32>
    %8 = arith.truncf %7 : vector<8x128xf32> to vector<8x128xbf16>
    %c0_6 = arith.constant 0 : index
    %c0_7 = arith.constant 0 : index
    %9 = vector.load %arg4[%c0_6, %c0_7] : memref<128x128xbf16, #tpu.memory_space<vmem>>, vector<128x128xbf16>
    %cst_8 = arith.constant dense<0.000000e+00> : vector<8x128xf32>
    %10 = tpu.matmul %8, %9, %cst_8 {dimension_numbers = #tpu.dot_dimension_numbers<[1], [0], [0], [1], [0, 0, 1, 1], [], []>} : vector<8x128xbf16>, vector<128x128xbf16>, vector<8x128xf32> -> vector<8x128xf32>
    %c0_9 = arith.constant 0 : index
    %c0_10 = arith.constant 0 : index
    %11 = vector.load %arg5[%c0_9, %c0_10] : memref<1x128xf32, #tpu.memory_space<vmem>>, vector<1x128xf32>
    %12 = vector.broadcast %11 : vector<1x128xf32> to vector<8x128xf32>
    %13 = arith.addf %10, %12 : vector<8x128xf32>
    %cst_11 = arith.constant 0.000000e+00 : f32
    %14 = vector.broadcast %cst_11 : f32 to vector<8x128xf32>
    %15 = arith.maximumf %13, %14 : vector<8x128xf32>
    %16 = arith.truncf %15 : vector<8x128xf32> to vector<8x128xbf16>
    %c0_12 = arith.constant 0 : index
    %c0_13 = arith.constant 0 : index
    %17 = vector.load %arg6[%c0_12, %c0_13] : memref<128x1xbf16, #tpu.memory_space<vmem>>, vector<128x1xbf16>
    %cst_14 = arith.constant dense<0.000000e+00> : vector<8x1xf32>
    %18 = tpu.matmul %16, %17, %cst_14 {dimension_numbers = #tpu.dot_dimension_numbers<[1], [0], [0], [1], [0, 0, 1, 1], [], []>} : vector<8x128xbf16>, vector<128x1xbf16>, vector<8x1xf32> -> vector<8x1xf32>
    %c0_15 = arith.constant 0 : index
    %c0_16 = arith.constant 0 : index
    %19 = memref.load %arg7[%c0_15, %c0_16] : memref<1x1xf32, #tpu.memory_space<smem>>
    %20 = vector.broadcast %19 : f32 to vector<8x1xf32>
    %21 = arith.addf %18, %20 : vector<8x1xf32>
    %c0_17 = arith.constant 0 : index
    %c0_18 = arith.constant 0 : index
    %22 = vector.load %arg8[%c0_17, %c0_18] : memref<8x1xf32, #tpu.memory_space<vmem>>, vector<8x1xf32>
    tpu.vector_store %arg8[%c0_17, %c0_18], %21 {strides = array<i32>} : memref<8x1xf32, #tpu.memory_space<vmem>>, vector<8x1xf32>,
    return
  }
  func.func @transform_0(%arg0: i32) -> (i32, i32) {
    %c0_i32 = arith.constant 0 : i32
    %c0_i32_0 = arith.constant 0 : i32
    return %arg0, %c0_i32 : i32, i32
  }
  func.func @transform_1(%arg0: i32) -> (i32, i32) {
    %c0_i32 = arith.constant 0 : i32
    %c0_i32_0 = arith.constant 0 : i32
    %c0_i32_1 = arith.constant 0 : i32
    return %c0_i32, %c0_i32_0 : i32, i32
  }
  func.func @transform_2(%arg0: i32) -> (i32, i32) {
    %c0_i32 = arith.constant 0 : i32
    %c0_i32_0 = arith.constant 0 : i32
    %c0_i32_1 = arith.constant 0 : i32
    return %c0_i32, %c0_i32_0 : i32, i32
  }
  func.func @transform_3(%arg0: i32) -> (i32, i32) {
    %c0_i32 = arith.constant 0 : i32
    %c0_i32_0 = arith.constant 0 : i32
    %c0_i32_1 = arith.constant 0 : i32
    return %c0_i32, %c0_i32_0 : i32, i32
  }
  func.func @transform_4(%arg0: i32) -> (i32, i32) {
    %c0_i32 = arith.constant 0 : i32
    %c0_i32_0 = arith.constant 0 : i32
    %c0_i32_1 = arith.constant 0 : i32
    return %c0_i32, %c0_i32_0 : i32, i32
  }
  func.func @transform_5(%arg0: i32) -> (i32, i32) {
    %c0_i32 = arith.constant 0 : i32
    %c0_i32_0 = arith.constant 0 : i32
    %c0_i32_1 = arith.constant 0 : i32
    return %c0_i32, %c0_i32_0 : i32, i32
  }
  func.func @transform_6(%arg0: i32) -> (i32, i32) {
    %c0_i32 = arith.constant 0 : i32
    %c0_i32_0 = arith.constant 0 : i32
    %c0_i32_1 = arith.constant 0 : i32
    return %c0_i32, %c0_i32_0 : i32, i32
  }
  func.func @transform_7(%arg0: i32) -> (i32, i32) {
    %c0_i32 = arith.constant 0 : i32
    %c0_i32_0 = arith.constant 0 : i32
    return %arg0, %c0_i32 : i32, i32
  }
}

</mosaic_0001>

<bundles_post_ra>
// kernel: tpu_custom_call.1
= control target key start
LH: loop header
LB: loop body
LE: loop exit
PB: predicated region body
PF: predicated region fallthrough
CT: control target
= control target key end

     0   :  { %13 = vsyncpa [#allocation4], 0  ;;  %s473_s24 = smov [#allocation3]   ;;  %s608_s0 = inlined_call_operand.vmem [shape: bf16[8,24], index: 0, kind: input, shape index: {}]   ;;  %s609_s1 = inlined_call_operand.hbm [shape: bf16[24,128], index: 1, kind: input, shape index: {}]   ;;  %s610_s2 = inlined_call_operand.vmem [shape: f32[1,128], index: 2, kind: input, shape index: {}]   ;;  %s611_s3 = inlined_call_operand.vmem [shape: bf16[128,128], index: 3, kind: input, shape index: {}]   ;;  %s612_s4 = inlined_call_operand.vmem [shape: f32[1,128], index: 4, kind: input, shape index: {}]   ;;  %s613_s5 = inlined_call_operand.vmem [shape: bf16[128,1], index: 5, kind: input, shape index: {}]   ;;  %s614_s6 = inlined_call_operand.<no memory space> [shape: f32[1,1], index: 6, kind: input, shape index: {}]   ;;  %s615_s7 = inlined_call_operand.vmem [shape: f32[8,1], index: 7, kind: output, shape index: {}]  }
   0x1   :  { %s21_s25 = sshll.u32 %s473_s24, 4  ;;  %s22_s25 = int_to_ptr.vmem [resolvable:$true] %s21_s25 }
   0x2   :  { %s459_s26 = scalar_lea.vmem %s22_s25, 192  ;;  %p464_p1 = scmp.lt.s32.totalorder %s22_s25, %s22_s25 }
   0x3   :  { %p460_p0 = scmp.ne.s32.totalorder %s22_s25, %s459_s26  ;;  %p465_p2 = scmp.lt.s32.totalorder %s459_s26, %s459_s26 }
   0x5   :  { %p466_p3 = por %p465_p2, %p464_p1 }
   0x7   :  { %p467_p4 = pnand %p466_p3, %p460_p0 }
   0x9   :  { %470 = shalt.err (!%p467_p4)
}
   0xa   :  { %s474_s27 = smov 64   ;;  %s475_s28 = smov 4  }
   0xb   :  { %27 = dma.hbm_to_vmem [thread:$0]  %s609_s1, 192, %s22_s25, [#allocation4], %s474_s27, %s474_s27, %s475_s28  }
   0xc   :  { %471 = dma.done.wait [#allocation4], 192  }
   0xd   :  { %472 = vsyncadd [#allocation4], 4294967104  ;;  %v476_v0 = vmov 0.0   ;;  %vm477_vm0 = vmmov 0   ;;  %vm66_vm1 = vcmask 1043456   ;;  %v435_v3 = vld [vmem:[%s611_s3 + $0x38] sm:$0xff]   ;;  %v242_v37 = vstv %s614_s6 }
   0xe   :  { %380 = vmatprep.subr.bf16.mxu0 %v476_v0  ;;  %384 = vmatprep.mubr.msk.bf16.mxu0 %vm477_vm0, %v476_v0  ;;  %v433_v1 = vld [vmem:[#allocation3 + $0x8] ss:$0 sps:$4 sm:$0xff]   ;;  %v434_v4 = vld [vmem:[#allocation3] sm:$0xff]   ;;  %v436_v5 = vld [vmem:[%s611_s3 + $0x30] sm:$0xff]   ;;  %vm62_vm2 = vcmask 195584   ;;  %vm331_vm3 = vcmask 7168  }
   0xf   :  { %388 = vmatprep.subr.bf16.mxu1 %v476_v0  ;;  %404 = vmatprep.mubr.msk.bf16.mxu1 %vm477_vm0, %v476_v0  ;;  %v68_v2 = vsel %vm66_vm1, %v433_v1, 0  ;;  %v42_v6 = vld [vmem:[%s608_s0] sm:$0xf]  ;;  %v437_v7 = vld [vmem:[%s611_s3 + $0x28] sm:$0xff]   ;;  %v439_v9 = vld [vmem:[%s611_s3 + $0x18] sm:$0xff]  }
  0x10   :  { %381 = vmatpush3.bf16.msra.mxu0 %v68_v2  ;;  %389 = vmatpush3.bf16.msra.mxu1 %v435_v3  ;;  %v438_v8 = vld [vmem:[%s611_s3 + $0x20] sm:$0xff]   ;;  %v440_v10 = vld [vmem:[%s611_s3 + $0x10] sm:$0xff]   ;;  %v441_v11 = vld [vmem:[%s611_s3 + $0x8] sm:$0xff]  }
  0x11   :  { %382 = vmatprep.subr.bf16.mxu0 %v476_v0  ;;  %390 = vmatprep.subr.bf16.mxu1 %v476_v0  ;;  %v442_v12 = vld [vmem:[%s611_s3] sm:$0xff]   ;;  %v443_v13 = vld [vmem:[%s613_s5 + $0x38] sm:$0xff]   ;;  %v444_v14 = vld [vmem:[%s613_s5 + $0x30] sm:$0xff]  }
  0x12   :  { %v445_v15 = vld [vmem:[%s613_s5 + $0x28] sm:$0xff]   ;;  %v446_v16 = vld [vmem:[%s613_s5 + $0x20] sm:$0xff]   ;;  %v447_v17 = vld [vmem:[%s613_s5 + $0x18] sm:$0xff]  }
  0x13   :  { %v448_v18 = vld [vmem:[%s613_s5 + $0x10] sm:$0xff]   ;;  %v338_v19 = vld [vmem:[%s610_s2] ss:$0 sm:$0xff]  ;;  %v449_v27 = vld [vmem:[%s613_s5 + $0x8] sm:$0xff]  }
  0x14   :  { %383 = vmatpush3.bf16.msra.mxu0 %v434_v4  ;;  %391 = vmatpush3.bf16.msra.mxu1 %v436_v5  ;;  %v450_v28 = vld [vmem:[%s613_s5] sm:$0xff]  }
  0x15   :  { %408 = vmatprep.subr.bf16.mxu0 %v476_v0  ;;  %392 = vmatprep.subr.bf16.mxu1 %v476_v0  ;;  %v342_v29 = vld [vmem:[%s612_s4] ss:$0 sm:$0xff] }
  0x17   :  { %385 = vmatmul.mubr.msk.bf16.vlgmr.msra.gmra.mxu0 %vm62_vm2, %v42_v6 }
  0x18   :  { %424 = vmatprep.mubr.msk.bf16.mxu0 %vm477_vm0, %v476_v0  ;;  %393 = vmatpush3.bf16.msra.mxu1 %v437_v7 }
  0x19   :  { %394 = vmatprep.subr.bf16.mxu1 %v476_v0  ;;  %409 = vmatpush3.bf16.msra.mxu0 %v443_v13 }
  0x1a   :  { %410 = vmatprep.subr.bf16.mxu0 %v476_v0 }
  0x1c   :  { %395 = vmatpush3.bf16.msra.mxu1 %v438_v8 }
  0x1d   :  { %396 = vmatprep.subr.bf16.mxu1 %v476_v0  ;;  %411 = vmatpush3.bf16.msra.mxu0 %v444_v14 }
  0x1e   :  { %412 = vmatprep.subr.bf16.mxu0 %v476_v0 }
  0x20   :  { %397 = vmatpush3.bf16.msra.mxu1 %v439_v9 }
  0x21   :  { %398 = vmatprep.subr.bf16.mxu1 %v476_v0  ;;  %413 = vmatpush3.bf16.msra.mxu0 %v445_v15 }
  0x22   :  { %414 = vmatprep.subr.bf16.mxu0 %v476_v0 }
  0x24   :  { %399 = vmatpush3.bf16.msra.mxu1 %v440_v10 }
  0x25   :  { %400 = vmatprep.subr.bf16.mxu1 %v476_v0  ;;  %415 = vmatpush3.bf16.msra.mxu0 %v446_v16 }
  0x26   :  { %416 = vmatprep.subr.bf16.mxu0 %v476_v0 }
  0x28   :  { %401 = vmatpush3.bf16.msra.mxu1 %v441_v11 }
  0x29   :  { %402 = vmatprep.subr.bf16.mxu1 %v476_v0  ;;  %417 = vmatpush3.bf16.msra.mxu0 %v447_v17 }
  0x2a   :  { %418 = vmatprep.subr.bf16.mxu0 %v476_v0 }
  0x2c   :  { %403 = vmatpush3.bf16.msra.mxu1 %v442_v12 }
  0x2d   :  { %419 = vmatpush3.bf16.msra.mxu0 %v448_v18 }
  0x2e   :  { %420 = vmatprep.subr.bf16.mxu0 %v476_v0 }
  0x31   :  { %421 = vmatpush3.bf16.msra.mxu0 %v449_v27 }
  0x32   :  { %422 = vmatprep.subr.bf16.mxu0 %v476_v0 }
  0x35   :  { %423 = vmatpush3.bf16.msra.mxu0 %v450_v28 }
  0xd7   :  { %v104_v20 = vpop.f32.mrf.mxu0 }
  0xd8   :  { %v105_v21 = vadd.f32 %v338_v19, %v104_v20 }
  0xd9   :  { %v386_v22 = vpop.f32.mrf.mxu0 }
  0xda   :  { %v110_v23 = vmax.f32 %v105_v21, 0.0 }
  0xdb   :  { %v107_v24 = vpop.f32.mrf.mxu0 }
  0xdc   :  { %v111_v25 = vpack.c.bf16 %v110_v23, %v110_v23 }
  0xdd   :  { %v387_v26 = vpop.f32.mrf.mxu0 }
  0xde   :  { %405 = vmatmul.mubr.bf16.vlgmr.msra.gmra.mxu1 %v111_v25 }
 0x19e   :  { %v217_v30 = vpop.f32.mrf.mxu1 }
 0x19f   :  { %v218_v31 = vadd.f32 %v342_v29, %v217_v30 }
 0x1a0   :  { %v406_v32 = vpop.f32.mrf.mxu1 }
 0x1a1   :  { %v223_v33 = vmax.f32 %v218_v31, 0.0 }
 0x1a2   :  { %v220_v34 = vpop.f32.mrf.mxu1 }
 0x1a3   :  { %v224_v35 = vpack.c.bf16 %v223_v33, %v223_v33 }
 0x1a4   :  { %v407_v36 = vpop.f32.mrf.mxu1 }
 0x1a5   :  { %425 = vmatmul.mubr.bf16.vlgmr.msra.gmra.mxu0 %v224_v35 }
 0x265   :  { %v325_v38 = vpop.f32.mrf.mxu0 }
 0x266   :  { %v326_v39 = vadd.f32 %v325_v38, %v242_v37 }
 0x267   :  { %v426_v40 = vpop.f32.mrf.mxu0 }
 0x268   :  { %332 = vst.msk [vmem:[%s615_s7] sm:$0xff] %vm331_vm3, %v326_v39 }
 0x269   :  { %v328_v41 = vpop.f32.mrf.mxu0 }
 0x26b   :  { %v427_v42 = vpop.f32.mrf.mxu0 }
 0x26c   :  { %337 = vsyncpa [#allocation4], 1 }

// kernel: tpu_custom_call.1
= control target key start
LH: loop header
LB: loop body
LE: loop exit
PB: predicated region body
PF: predicated region fallthrough
CT: control target
= control target key end

     0   :  { %13 = vsyncpa [#allocation4], 0  ;;  %s473_s24 = smov [#allocation3]   ;;  %s608_s0 = inlined_call_operand.vmem [shape: bf16[8,24], index: 0, kind: input, shape index: {}]   ;;  %s609_s1 = inlined_call_operand.hbm [shape: bf16[24,128], index: 1, kind: input, shape index: {}]   ;;  %s610_s2 = inlined_call_operand.vmem [shape: f32[1,128], index: 2, kind: input, shape index: {}]   ;;  %s611_s3 = inlined_call_operand.vmem [shape: bf16[128,128], index: 3, kind: input, shape index: {}]   ;;  %s612_s4 = inlined_call_operand.vmem [shape: f32[1,128], index: 4, kind: input, shape index: {}]   ;;  %s613_s5 = inlined_call_operand.vmem [shape: bf16[128,1], index: 5, kind: input, shape index: {}]   ;;  %s614_s6 = inlined_call_operand.<no memory space> [shape: f32[1,1], index: 6, kind: input, shape index: {}]   ;;  %s615_s7 = inlined_call_operand.vmem [shape: f32[8,1], index: 7, kind: output, shape index: {}]  }
   0x1   :  { %s21_s25 = sshll.u32 %s473_s24, 4  ;;  %s22_s25 = int_to_ptr.vmem [resolvable:$true] %s21_s25 }
   0x2   :  { %s459_s26 = scalar_lea.vmem %s22_s25, 192  ;;  %p464_p1 = scmp.lt.s32.totalorder %s22_s25, %s22_s25 }
   0x3   :  { %p460_p0 = scmp.ne.s32.totalorder %s22_s25, %s459_s26  ;;  %p465_p2 = scmp.lt.s32.totalorder %s459_s26, %s459_s26 }
   0x5   :  { %p466_p3 = por %p465_p2, %p464_p1 }
   0x7   :  { %p467_p4 = pnand %p466_p3, %p460_p0 }
   0x9   :  { %470 = shalt.err (!%p467_p4)
}
   0xa   :  { %s474_s27 = smov 64   ;;  %s475_s28 = smov 4  }
   0xb   :  { %27 = dma.hbm_to_vmem [thread:$0]  %s609_s1, 192, %s22_s25, [#allocation4], %s474_s27, %s474_s27, %s475_s28  }
   0xc   :  { %471 = dma.done.wait [#allocation4], 192  }
   0xd   :  { %472 = vsyncadd [#allocation4], 4294967104  ;;  %v476_v0 = vmov 0.0   ;;  %vm477_vm0 = vmmov 0   ;;  %vm66_vm1 = vcmask 1043456   ;;  %v435_v3 = vld [vmem:[%s611_s3 + $0x38] sm:$0xff]   ;;  %v242_v37 = vstv %s614_s6 }
   0xe   :  { %380 = vmatprep.subr.bf16.mxu0 %v476_v0  ;;  %384 = vmatprep.mubr.msk.bf16.mxu0 %vm477_vm0, %v476_v0  ;;  %v433_v1 = vld [vmem:[#allocation3 + $0x8] ss:$0 sps:$4 sm:$0xff]   ;;  %v434_v4 = vld [vmem:[#allocation3] sm:$0xff]   ;;  %v436_v5 = vld [vmem:[%s611_s3 + $0x30] sm:$0xff]   ;;  %vm62_vm2 = vcmask 195584   ;;  %vm331_vm3 = vcmask 7168  }
   0xf   :  { %388 = vmatprep.subr.bf16.mxu1 %v476_v0  ;;  %404 = vmatprep.mubr.msk.bf16.mxu1 %vm477_vm0, %v476_v0  ;;  %v68_v2 = vsel %vm66_vm1, %v433_v1, 0  ;;  %v42_v6 = vld [vmem:[%s608_s0] sm:$0xf]  ;;  %v437_v7 = vld [vmem:[%s611_s3 + $0x28] sm:$0xff]   ;;  %v439_v9 = vld [vmem:[%s611_s3 + $0x18] sm:$0xff]  }
  0x10   :  { %381 = vmatpush3.bf16.msra.mxu0 %v68_v2  ;;  %389 = vmatpush3.bf16.msra.mxu1 %v435_v3  ;;  %v438_v8 = vld [vmem:[%s611_s3 + $0x20] sm:$0xff]   ;;  %v440_v10 = vld [vmem:[%s611_s3 + $0x10] sm:$0xff]   ;;  %v441_v11 = vld [vmem:[%s611_s3 + $0x8] sm:$0xff]  }
  0x11   :  { %382 = vmatprep.subr.bf16.mxu0 %v476_v0  ;;  %390 = vmatprep.subr.bf16.mxu1 %v476_v0  ;;  %v442_v12 = vld [vmem:[%s611_s3] sm:$0xff]   ;;  %v443_v13 = vld [vmem:[%s613_s5 + $0x38] sm:$0xff]   ;;  %v444_v14 = vld [vmem:[%s613_s5 + $0x30] sm:$0xff]  }
  0x12   :  { %v445_v15 = vld [vmem:[%s613_s5 + $0x28] sm:$0xff]   ;;  %v446_v16 = vld [vmem:[%s613_s5 + $0x20] sm:$0xff]   ;;  %v447_v17 = vld [vmem:[%s613_s5 + $0x18] sm:$0xff]  }
  0x13   :  { %v448_v18 = vld [vmem:[%s613_s5 + $0x10] sm:$0xff]   ;;  %v338_v19 = vld [vmem:[%s610_s2] ss:$0 sm:$0xff]  ;;  %v449_v27 = vld [vmem:[%s613_s5 + $0x8] sm:$0xff]  }
  0x14   :  { %383 = vmatpush3.bf16.msra.mxu0 %v434_v4  ;;  %391 = vmatpush3.bf16.msra.mxu1 %v436_v5  ;;  %v450_v28 = vld [vmem:[%s613_s5] sm:$0xff]  }
  0x15   :  { %408 = vmatprep.subr.bf16.mxu0 %v476_v0  ;;  %392 = vmatprep.subr.bf16.mxu1 %v476_v0  ;;  %v342_v29 = vld [vmem:[%s612_s4] ss:$0 sm:$0xff] }
  0x17   :  { %385 = vmatmul.mubr.msk.bf16.vlgmr.msra.gmra.mxu0 %vm62_vm2, %v42_v6 }
  0x18   :  { %424 = vmatprep.mubr.msk.bf16.mxu0 %vm477_vm0, %v476_v0  ;;  %393 = vmatpush3.bf16.msra.mxu1 %v437_v7 }
  0x19   :  { %394 = vmatprep.subr.bf16.mxu1 %v476_v0  ;;  %409 = vmatpush3.bf16.msra.mxu0 %v443_v13 }
  0x1a   :  { %410 = vmatprep.subr.bf16.mxu0 %v476_v0 }
  0x1c   :  { %395 = vmatpush3.bf16.msra.mxu1 %v438_v8 }
  0x1d   :  { %396 = vmatprep.subr.bf16.mxu1 %v476_v0  ;;  %411 = vmatpush3.bf16.msra.mxu0 %v444_v14 }
  0x1e   :  { %412 = vmatprep.subr.bf16.mxu0 %v476_v0 }
  0x20   :  { %397 = vmatpush3.bf16.msra.mxu1 %v439_v9 }
  0x21   :  { %398 = vmatprep.subr.bf16.mxu1 %v476_v0  ;;  %413 = vmatpush3.bf16.msra.mxu0 %v445_v15 }
  0x22   :  { %414 = vmatprep.subr.bf16.mxu0 %v476_v0 }
  0x24   :  { %399 = vmatpush3.bf16.msra.mxu1 %v440_v10 }
  0x25   :  { %400 = vmatprep.subr.bf16.mxu1 %v476_v0  ;;  %415 = vmatpush3.bf16.msra.mxu0 %v446_v16 }
  0x26   :  { %416 = vmatprep.subr.bf16.mxu0 %v476_v0 }
  0x28   :  { %401 = vmatpush3.bf16.msra.mxu1 %v441_v11 }
  0x29   :  { %402 = vmatprep.subr.bf16.mxu1 %v476_v0  ;;  %417 = vmatpush3.bf16.msra.mxu0 %v447_v17 }
  0x2a   :  { %418 = vmatprep.subr.bf16.mxu0 %v476_v0 }
  0x2c   :  { %403 = vmatpush3.bf16.msra.mxu1 %v442_v12 }
  0x2d   :  { %419 = vmatpush3.bf16.msra.mxu0 %v448_v18 }
  0x2e   :  { %420 = vmatprep.subr.bf16.mxu0 %v476_v0 }
  0x31   :  { %421 = vmatpush3.bf16.msra.mxu0 %v449_v27 }
  0x32   :  { %422 = vmatprep.subr.bf16.mxu0 %v476_v0 }
  0x35   :  { %423 = vmatpush3.bf16.msra.mxu0 %v450_v28 }
  0xd7   :  { %v104_v20 = vpop.f32.mrf.mxu0 }
  0xd8   :  { %v105_v21 = vadd.f32 %v338_v19, %v104_v20 }
  0xd9   :  { %v386_v22 = vpop.f32.mrf.mxu0 }
  0xda   :  { %v110_v23 = vmax.f32 %v105_v21, 0.0 }
  0xdb   :  { %v107_v24 = vpop.f32.mrf.mxu0 }
  0xdc   :  { %v111_v25 = vpack.c.bf16 %v110_v23, %v110_v23 }
  0xdd   :  { %v387_v26 = vpop.f32.mrf.mxu0 }
  0xde   :  { %405 = vmatmul.mubr.bf16.vlgmr.msra.gmra.mxu1 %v111_v25 }
 0x19e   :  { %v217_v30 = vpop.f32.mrf.mxu1 }
 0x19f   :  { %v218_v31 = vadd.f32 %v342_v29, %v217_v30 }
 0x1a0   :  { %v406_v32 = vpop.f32.mrf.mxu1 }
 0x1a1   :  { %v223_v33 = vmax.f32 %v218_v31, 0.0 }
 0x1a2   :  { %v220_v34 = vpop.f32.mrf.mxu1 }
 0x1a3   :  { %v224_v35 = vpack.c.bf16 %v223_v33, %v223_v33 }
 0x1a4   :  { %v407_v36 = vpop.f32.mrf.mxu1 }
 0x1a5   :  { %425 = vmatmul.mubr.bf16.vlgmr.msra.gmra.mxu0 %v224_v35 }
 0x265   :  { %v325_v38 = vpop.f32.mrf.mxu0 }
 0x266   :  { %v326_v39 = vadd.f32 %v325_v38, %v242_v37 }
 0x267   :  { %v426_v40 = vpop.f32.mrf.mxu0 }
 0x268   :  { %332 = vst.msk [vmem:[%s615_s7] sm:$0xff] %vm331_vm3, %v326_v39 }
 0x269   :  { %v328_v41 = vpop.f32.mrf.mxu0 }
 0x26b   :  { %v427_v42 = vpop.f32.mrf.mxu0 }
 0x26c   :  { %337 = vsyncpa [#allocation4], 1 }

</bundles_post_ra>
